<compile_context>
chip_gen: v5e
topology: v5e:2x2
jax: 0.10.0
libtpu: 0.0.40
codegen_flags: <defaults>
</compile_context>

<pallas_src>
import math

import jax
import jax.numpy as jnp
from jax.experimental import pallas as pl
from jax.experimental.pallas import tpu as pltpu

LANES = 128  # lane-dense output width


def _round_up(x, m):
    return ((x + m - 1) // m) * m


def qnet_kernel(x_ref, a_ref, w1x_ref, w1a_ref, b1_ref, w2_ref, b2_ref,
                w3_ref, b3_ref, o_ref):
    """Fused 3-layer MLP tile: relu(relu(x@W1x + a@W1a + b1) @ W2 + b2) . w3 + b3."""
    # Layer 1: two partial matmuls replace the concat. bf16 into the MXU, f32 accum.
    x_bf = x_ref[...].astype(jnp.bfloat16)
    a_bf = a_ref[...].astype(jnp.bfloat16)
    h1 = (
        jnp.dot(x_bf, w1x_ref[...], preferred_element_type=jnp.float32)
        + jnp.dot(a_bf, w1a_ref[...], preferred_element_type=jnp.float32)
        + b1_ref[...]
    )
    h1 = jnp.maximum(h1, 0.0)

    # Layer 2: bf16 MXU matmul, f32 bias + ReLU.
    h2 = jnp.dot(h1.astype(jnp.bfloat16), w2_ref[...],
                 preferred_element_type=jnp.float32) + b2_ref[...]
    h2 = jnp.maximum(h2, 0.0)

    # Layer 3 (256 -> 1): VPU multiply + cross-lane reduce instead of a 1-column
    # MXU matmul; bias comes from SMEM as a scalar.
    q = jnp.sum(h2 * w3_ref[...], axis=-1, keepdims=True) + b3_ref[0]

    # Lane-dense store: broadcast the scalar column across 128 lanes (unmasked vst);
    # the wrapper slices [:, :1].
    o_ref[...] = jnp.broadcast_to(q, o_ref.shape).astype(o_ref.dtype)


def qnetwork_forward(x, a, params):
    """x: [B, obs_dim], a: [B, act_dim] -> q: [B, 1] (float32)."""
    w1x, w1a, b1, w2, b2, w3, b3 = params
    B, obs_dim = x.shape
    act_dim = a.shape[1]
    H = w2.shape[0]

    # Batch tiling: weights stay VMEM-resident (constant block index), activation
    # tiles pipeline over the grid.
    TILE_B = 256 if B >= 256 else _round_up(B, 8)
    B_pad = _round_up(B, TILE_B)
    if B_pad != B:
        x = jnp.pad(x, ((0, B_pad - B), (0, 0)))
        a = jnp.pad(a, ((0, B_pad - B), (0, 0)))

    grid = (B_pad // TILE_B,)

    in_specs = [
        pl.BlockSpec((TILE_B, obs_dim), lambda i: (i, 0)),   # x
        pl.BlockSpec((TILE_B, act_dim), lambda i: (i, 0)),   # a
        pl.BlockSpec((obs_dim, H), lambda i: (0, 0)),        # W1x (resident)
        pl.BlockSpec((act_dim, H), lambda i: (0, 0)),        # W1a (resident)
        pl.BlockSpec((1, H), lambda i: (0, 0)),              # b1  (resident)
        pl.BlockSpec((H, H), lambda i: (0, 0)),              # W2  (resident)
        pl.BlockSpec((1, H), lambda i: (0, 0)),              # b2  (resident)
        pl.BlockSpec((1, H), lambda i: (0, 0)),              # w3 row (resident)
        pl.BlockSpec(memory_space=pltpu.MemorySpace.SMEM),   # b3 scalar in SMEM
    ]
    out_specs = pl.BlockSpec((TILE_B, LANES), lambda i: (i, 0))

    out = pl.pallas_call(
        qnet_kernel,
        out_shape=jax.ShapeDtypeStruct((B_pad, LANES), jnp.float32),
        grid=grid,
        in_specs=in_specs,
        out_specs=out_specs,
        compiler_params=pltpu.CompilerParams(
            dimension_semantics=("parallel",)),  # megacore split on v7x
    )(x, a, w1x, w1a, b1, w2, b2, w3, b3)

    return out[:B, :1]


def init_qnetwork_params(key, obs_dim, act_dim, hidden=256):
    """torch.nn.Linear-style init (U[-1/sqrt(fan_in), 1/sqrt(fan_in)]).

    Storage layout (kernel-friendly):
      W1x: [obs_dim, H] bf16, W1a: [act_dim, H] bf16  (split of W1, transposed)
      b1, b2: [1, H] f32
      W2: [H, H] bf16
      w3: [1, H] f32 (row form of the [H, 1] weight), b3: [1] f32
    """
    in_dim = obs_dim + act_dim
    k1w, k1b, k2w, k2b, k3w, k3b = jax.random.split(key, 6)

    bound1 = 1.0 / math.sqrt(in_dim)
    w1 = jax.random.uniform(k1w, (in_dim, hidden), jnp.float32, -bound1, bound1)
    b1 = jax.random.uniform(k1b, (1, hidden), jnp.float32, -bound1, bound1)
    w1x = w1[:obs_dim].astype(jnp.bfloat16)
    w1a = w1[obs_dim:].astype(jnp.bfloat16)

    bound2 = 1.0 / math.sqrt(hidden)
    w2 = jax.random.uniform(k2w, (hidden, hidden), jnp.float32, -bound2, bound2)
    b2 = jax.random.uniform(k2b, (1, hidden), jnp.float32, -bound2, bound2)
    w2 = w2.astype(jnp.bfloat16)

    bound3 = 1.0 / math.sqrt(hidden)
    w3 = jax.random.uniform(k3w, (1, hidden), jnp.float32, -bound3, bound3)
    b3 = jax.random.uniform(k3b, (1,), jnp.float32, -bound3, bound3)

    return (w1x, w1a, b1, w2, b2, w3, b3)


if __name__ == "__main__":
    key = jax.random.PRNGKey(0)
    k_params, k_x, k_a = jax.random.split(key, 3)

    # Small, forward-consistent shapes: batch=8, obs_dim=17, act_dim=6
    # (MuJoCo-style continuous-control env).
    B, OBS_DIM, ACT_DIM = 8, 17, 6

    params = init_qnetwork_params(k_params, OBS_DIM, ACT_DIM, hidden=256)
    x = jax.random.normal(k_x, (B, OBS_DIM), jnp.float32)
    a = jax.random.normal(k_a, (B, ACT_DIM), jnp.float32)

    q = qnetwork_forward(x, a, params)
    q = jax.block_until_ready(q)

    # Reference with the same bf16 input quantization (accumulation in f32),
    # matching the MXU path of the kernel.
    w1x, w1a, b1, w2, b2, w3, b3 = params
    xb = x.astype(jnp.bfloat16).astype(jnp.float32)
    ab = a.astype(jnp.bfloat16).astype(jnp.float32)
    h1 = jnp.maximum(
        xb @ w1x.astype(jnp.float32) + ab @ w1a.astype(jnp.float32) + b1, 0.0)
    h1 = h1.astype(jnp.bfloat16).astype(jnp.float32)
    h2 = jnp.maximum(h1 @ w2.astype(jnp.float32) + b2, 0.0)
    ref = jnp.sum(h2 * w3, axis=-1, keepdims=True) + b3[0]

    assert q.shape == (B, 1)
    assert jnp.allclose(q, ref, atol=2e-3, rtol=2e-3), (
        f"max abs diff = {jnp.max(jnp.abs(q - ref))}")

    print("KERNEL_OK")
</pallas_src>

<mosaic_0001>
module attributes {stable_mosaic.version = 11 : i64} {
  func.func @qnet_kernel(%arg0: i32, %arg1: memref<8x17xf32, #tpu.memory_space<vmem>>, %arg2: memref<8x6xf32, #tpu.memory_space<vmem>>, %arg3: memref<17x256xbf16, #tpu.memory_space<vmem>>, %arg4: memref<6x256xbf16, #tpu.memory_space<vmem>>, %arg5: memref<1x256xf32, #tpu.memory_space<vmem>>, %arg6: memref<256x256xbf16, #tpu.memory_space<vmem>>, %arg7: memref<1x256xf32, #tpu.memory_space<vmem>>, %arg8: memref<1x256xf32, #tpu.memory_space<vmem>>, %arg9: memref<1xf32, #tpu.memory_space<smem>>, %arg10: memref<8x128xf32, #tpu.memory_space<vmem>>) attributes {dimension_semantics = [#tpu.dimension_semantics<parallel>], iteration_bounds = array<i64: 1>, scalar_prefetch = 0 : i64, scratch_operands = 0 : i64, tpu.core_type = #tpu.core_type<tc>, window_params = [{transform_indices = @transform_0, window_bounds = array<i64: 8, 17>}, {transform_indices = @transform_1, window_bounds = array<i64: 8, 6>}, {pipeline_mode = #tpu.pipeline_mode<synchronous>, transform_indices = @transform_2, window_bounds = array<i64: 17, 256>}, {pipeline_mode = #tpu.pipeline_mode<synchronous>, transform_indices = @transform_3, window_bounds = array<i64: 6, 256>}, {pipeline_mode = #tpu.pipeline_mode<synchronous>, transform_indices = @transform_4, window_bounds = array<i64: 1, 256>}, {pipeline_mode = #tpu.pipeline_mode<synchronous>, transform_indices = @transform_5, window_bounds = array<i64: 256, 256>}, {pipeline_mode = #tpu.pipeline_mode<synchronous>, transform_indices = @transform_6, window_bounds = array<i64: 1, 256>}, {pipeline_mode = #tpu.pipeline_mode<synchronous>, transform_indices = @transform_7, window_bounds = array<i64: 1, 256>}, {transform_indices = @transform_8, window_bounds = array<i64: 1>}, {transform_indices = @transform_9, window_bounds = array<i64: 8, 128>}]} {
    %c0 = arith.constant 0 : index
    %c0_0 = arith.constant 0 : index
    %0 = vector.load %arg1[%c0, %c0_0] : memref<8x17xf32, #tpu.memory_space<vmem>>, vector<8x17xf32>
    %1 = arith.truncf %0 : vector<8x17xf32> to vector<8x17xbf16>
    %c0_1 = arith.constant 0 : index
    %c0_2 = arith.constant 0 : index
    %2 = vector.load %arg2[%c0_1, %c0_2] : memref<8x6xf32, #tpu.memory_space<vmem>>, vector<8x6xf32>
    %3 = arith.truncf %2 : vector<8x6xf32> to vector<8x6xbf16>
    %c0_3 = arith.constant 0 : index
    %c0_4 = arith.constant 0 : index
    %4 = vector.load %arg3[%c0_3, %c0_4] : memref<17x256xbf16, #tpu.memory_space<vmem>>, vector<17x256xbf16>
    %cst = arith.constant dense<0.000000e+00> : vector<8x256xf32>
    %5 = tpu.matmul %1, %4, %cst {dimension_numbers = #tpu.dot_dimension_numbers<[1], [0], [0], [1], [0, 0, 1, 1], [], []>} : vector<8x17xbf16>, vector<17x256xbf16>, vector<8x256xf32> -> vector<8x256xf32>
    %c0_5 = arith.constant 0 : index
    %c0_6 = arith.constant 0 : index
    %6 = vector.load %arg4[%c0_5, %c0_6] : memref<6x256xbf16, #tpu.memory_space<vmem>>, vector<6x256xbf16>
    %cst_7 = arith.constant dense<0.000000e+00> : vector<8x256xf32>
    %7 = tpu.matmul %3, %6, %cst_7 {dimension_numbers = #tpu.dot_dimension_numbers<[1], [0], [0], [1], [0, 0, 1, 1], [], []>} : vector<8x6xbf16>, vector<6x256xbf16>, vector<8x256xf32> -> vector<8x256xf32>
    %8 = arith.addf %5, %7 : vector<8x256xf32>
    %c0_8 = arith.constant 0 : index
    %c0_9 = arith.constant 0 : index
    %9 = vector.load %arg5[%c0_8, %c0_9] : memref<1x256xf32, #tpu.memory_space<vmem>>, vector<1x256xf32>
    %10 = vector.broadcast %9 : vector<1x256xf32> to vector<8x256xf32>
    %11 = arith.addf %8, %10 : vector<8x256xf32>
    %cst_10 = arith.constant 0.000000e+00 : f32
    %12 = vector.broadcast %cst_10 : f32 to vector<8x256xf32>
    %13 = arith.maximumf %11, %12 : vector<8x256xf32>
    %14 = arith.truncf %13 : vector<8x256xf32> to vector<8x256xbf16>
    %c0_11 = arith.constant 0 : index
    %c0_12 = arith.constant 0 : index
    %15 = vector.load %arg6[%c0_11, %c0_12] : memref<256x256xbf16, #tpu.memory_space<vmem>>, vector<256x256xbf16>
    %cst_13 = arith.constant dense<0.000000e+00> : vector<8x256xf32>
    %16 = tpu.matmul %14, %15, %cst_13 {dimension_numbers = #tpu.dot_dimension_numbers<[1], [0], [0], [1], [0, 0, 1, 1], [], []>} : vector<8x256xbf16>, vector<256x256xbf16>, vector<8x256xf32> -> vector<8x256xf32>
    %c0_14 = arith.constant 0 : index
    %c0_15 = arith.constant 0 : index
    %17 = vector.load %arg7[%c0_14, %c0_15] : memref<1x256xf32, #tpu.memory_space<vmem>>, vector<1x256xf32>
    %18 = vector.broadcast %17 : vector<1x256xf32> to vector<8x256xf32>
    %19 = arith.addf %16, %18 : vector<8x256xf32>
    %cst_16 = arith.constant 0.000000e+00 : f32
    %20 = vector.broadcast %cst_16 : f32 to vector<8x256xf32>
    %21 = arith.maximumf %19, %20 : vector<8x256xf32>
    %c0_17 = arith.constant 0 : index
    %c0_18 = arith.constant 0 : index
    %22 = vector.load %arg8[%c0_17, %c0_18] : memref<1x256xf32, #tpu.memory_space<vmem>>, vector<1x256xf32>
    %23 = vector.broadcast %22 : vector<1x256xf32> to vector<8x256xf32>
    %24 = arith.mulf %21, %23 : vector<8x256xf32>
    %cst_19 = arith.constant dense<0.000000e+00> : vector<8xf32>
    %25 = vector.multi_reduction <add>, %24, %cst_19 [1] : vector<8x256xf32> to vector<8xf32>
    %26 = vector.shape_cast %25 : vector<8xf32> to vector<8x1xf32>
    %c0_20 = arith.constant 0 : index
    %27 = memref.load %arg9[%c0_20] : memref<1xf32, #tpu.memory_space<smem>>
    %28 = vector.broadcast %27 : f32 to vector<8x1xf32>
    %29 = arith.addf %26, %28 : vector<8x1xf32>
    %30 = vector.shape_cast %29 : vector<8x1xf32> to vector<8x1xf32>
    %31 = vector.broadcast %30 : vector<8x1xf32> to vector<8x128xf32>
    %c0_21 = arith.constant 0 : index
    %c0_22 = arith.constant 0 : index
    %32 = vector.load %arg10[%c0_21, %c0_22] : memref<8x128xf32, #tpu.memory_space<vmem>>, vector<8x128xf32>
    tpu.vector_store %arg10[%c0_21, %c0_22], %31 {strides = array<i32>} : memref<8x128xf32, #tpu.memory_space<vmem>>, vector<8x128xf32>,
    return
  }
  func.func @transform_0(%arg0: i32) -> (i32, i32) {
    %c0_i32 = arith.constant 0 : i32
    %c0_i32_0 = arith.constant 0 : i32
    return %arg0, %c0_i32 : i32, i32
  }
  func.func @transform_1(%arg0: i32) -> (i32, i32) {
    %c0_i32 = arith.constant 0 : i32
    %c0_i32_0 = arith.constant 0 : i32
    return %arg0, %c0_i32 : i32, i32
  }
  func.func @transform_2(%arg0: i32) -> (i32, i32) {
    %c0_i32 = arith.constant 0 : i32
    %c0_i32_0 = arith.constant 0 : i32
    %c0_i32_1 = arith.constant 0 : i32
    return %c0_i32, %c0_i32_0 : i32, i32
  }
  func.func @transform_3(%arg0: i32) -> (i32, i32) {
    %c0_i32 = arith.constant 0 : i32
    %c0_i32_0 = arith.constant 0 : i32
    %c0_i32_1 = arith.constant 0 : i32
    return %c0_i32, %c0_i32_0 : i32, i32
  }
  func.func @transform_4(%arg0: i32) -> (i32, i32) {
    %c0_i32 = arith.constant 0 : i32
    %c0_i32_0 = arith.constant 0 : i32
    %c0_i32_1 = arith.constant 0 : i32
    return %c0_i32, %c0_i32_0 : i32, i32
  }
  func.func @transform_5(%arg0: i32) -> (i32, i32) {
    %c0_i32 = arith.constant 0 : i32
    %c0_i32_0 = arith.constant 0 : i32
    %c0_i32_1 = arith.constant 0 : i32
    return %c0_i32, %c0_i32_0 : i32, i32
  }
  func.func @transform_6(%arg0: i32) -> (i32, i32) {
    %c0_i32 = arith.constant 0 : i32
    %c0_i32_0 = arith.constant 0 : i32
    %c0_i32_1 = arith.constant 0 : i32
    return %c0_i32, %c0_i32_0 : i32, i32
  }
  func.func @transform_7(%arg0: i32) -> (i32, i32) {
    %c0_i32 = arith.constant 0 : i32
    %c0_i32_0 = arith.constant 0 : i32
    %c0_i32_1 = arith.constant 0 : i32
    return %c0_i32, %c0_i32_0 : i32, i32
  }
  func.func @transform_8(%arg0: i32) -> i32 {
    %c0_i32 = arith.constant 0 : i32
    %c0_i32_0 = arith.constant 0 : i32
    return %c0_i32 : i32
  }
  func.func @transform_9(%arg0: i32) -> (i32, i32) {
    %c0_i32 = arith.constant 0 : i32
    %c0_i32_0 = arith.constant 0 : i32
    return %arg0, %c0_i32 : i32, i32
  }
}

</mosaic_0001>

<bundles_post_ra>
// kernel: tpu_custom_call.1
= control target key start
LH: loop header
LB: loop body
LE: loop exit
PB: predicated region body
PF: predicated region fallthrough
CT: control target
= control target key end

     0   :  { %15 = vsyncpa [#allocation4], 0  ;;  %s937_s0 = inlined_call_operand.hbm [shape: f32[8,17], index: 0, kind: input, shape index: {}]   ;;  %s938_s1 = inlined_call_operand.hbm [shape: f32[8,6], index: 1, kind: input, shape index: {}]   ;;  %s939_s2 = inlined_call_operand.hbm [shape: bf16[17,256], index: 2, kind: input, shape index: {}]   ;;  %s940_s3 = inlined_call_operand.hbm [shape: bf16[6,256], index: 3, kind: input, shape index: {}]   ;;  %s941_s4 = inlined_call_operand.vmem [shape: f32[1,256], index: 4, kind: input, shape index: {}]   ;;  %s942_s5 = inlined_call_operand.hbm [shape: bf16[256,256], index: 5, kind: input, shape index: {}]   ;;  %s943_s6 = inlined_call_operand.vmem [shape: f32[1,256], index: 6, kind: input, shape index: {}]   ;;  %s944_s7 = inlined_call_operand.vmem [shape: f32[1,256], index: 7, kind: input, shape index: {}]   ;;  %s945_s8 = inlined_call_operand.<no memory space> [shape: f32[1], index: 8, kind: input, shape index: {}]   ;;  %s946_s9 = inlined_call_operand.hbm [shape: f32[8,128], index: 9, kind: output, shape index: {}]  }
   0x1   :  { %16 = vsyncpa [#allocation7], 0 }
   0x2   :  { %17 = vsyncpa [#allocation10], 0  ;;  %s35_s11 = sshll.u32 %s938_s1, 4  ;;  %s36_s11 = int_to_ptr.hbm [resolvable:$true] %s35_s11 }
   0x3   :  { %18 = vsyncpa [#allocation5], 0  ;;  %s844_s12 = smov [#allocation6]   ;;  %s59_s16 = sshll.u32 %s940_s3, 4  ;;  %s60_s16 = int_to_ptr.hbm [resolvable:$true] %s59_s16 }
   0x4   :  { %s37_s13 = sshll.u32 %s844_s12, 4  ;;  %s845_s17 = smov [#allocation9]   ;;  %s38_s13 = int_to_ptr.vmem [resolvable:$true] %s37_s13 }
   0x5   :  { %40 = dma.hbm_to_vmem [thread:$0]  %s36_s11, 128, %s38_s13, [#allocation7]  }
   0x6   :  { %s61_s18 = sshll.u32 %s845_s17, 4  ;;  %s24_s21 = sshll.u32 %s937_s0, 4  ;;  %s62_s18 = int_to_ptr.vmem [resolvable:$true] %s61_s18  ;;  %s25_s21 = int_to_ptr.hbm [resolvable:$true] %s24_s21 }
   0x7   :  { %64 = dma.hbm_to_vmem [thread:$0]  %s60_s16, 128, %s62_s18, [#allocation10]  }
   0x8   :  { %s45_s23 = sshll.u32 %s939_s2, 4  ;;  %s846_s24 = smov [#allocation3]   ;;  %s46_s23 = int_to_ptr.hbm [resolvable:$true] %s45_s23 }
   0x9   :  { %s26_s25 = sshll.u32 %s846_s24, 4  ;;  %s847_s3 = smov [#allocation8]   ;;  %s27_s25 = int_to_ptr.vmem [resolvable:$true] %s26_s25 }
   0xa   :  { %29 = dma.hbm_to_vmem [thread:$0]  %s25_s21, 128, %s27_s25, [#allocation4]  }
   0xb   :  { %s47_s26 = sshll.u32 %s847_s3, 4  ;;  %s848_s27 = smov 128   ;;  %s48_s26 = int_to_ptr.vmem [resolvable:$true] %s47_s26 }
   0xc   :  { %s849_s28 = smov 8   ;;  %s71_s30 = sshll.u32 %s942_s5, 4  ;;  %s72_s30 = int_to_ptr.hbm [resolvable:$true] %s71_s30 }
   0xd   :  { %53 = dma.hbm_to_vmem [thread:$0]  %s46_s23, 384, %s48_s26, [#allocation7], %s848_s27, %s848_s27, %s849_s28  }
   0xe   :  { %s850_s10 = smov [#allocation11]  }
   0xf   :  { %s73_s11 = sshll.u32 %s850_s10, 4  ;;  %s74_s11 = int_to_ptr.vmem [resolvable:$true] %s73_s11 }
  0x10   :  { %79 = dma.hbm_to_vmem [thread:$0]  %s72_s30, 4096, %s74_s11, [#allocation10], %s848_s27, %s848_s27, %s849_s28  }
  0x11   :  { %836 = dma.done.wait [#allocation4], 128  }
  0x12   :  { %837 = vsyncadd [#allocation4], 4294967168 }
  0x13   :  { %838 = dma.done.wait [#allocation7], 512  }
  0x14   :  { %839 = vsyncadd [#allocation7], 4294966784 }
  0x15   :  { %840 = dma.done.wait [#allocation10], 4224  }
  0x16   :  { %841 = vsyncadd [#allocation10], 4294963072  ;;  %vm176_vm0 = vcmask 1040384   ;;  %v113_v0 = vld [vmem:[#allocation8 + $0x10] sm:$0x11]  ;;  %vm124_vm1 = vcmask 1042432  }
  0x17   :  { %v114_v1 = vld [vmem:[#allocation9] sm:$0x77]  ;;  %vm120_vm2 = vcmask 48128   ;;  %v164_v2 = vunpack.c.l.b16 %v113_v0  ;;  %v165_v3 = vunpack.c.h.b16 %v113_v0  ;;  %v851_v6 = vmov 0   ;;  %v513_v8 = vld [vmem:[#allocation8] sm:$0xf] }
  0x18   :  { %v116_v4 = vunpack.c.l.b16 %v114_v1  ;;  %v117_v5 = vunpack.c.h.b16 %v114_v1  ;;  %v178_v7 = vsel %vm176_vm0, 65535, %v851_v6  ;;  %v650_v9 = vld [vmem:[#allocation8 + $0x4] sm:$0xf0]  ;;  %v649_v10 = vld [vmem:[#allocation8 + $0x4] sm:$0xf]  ;;  %v109_v12 = vld [vmem:[#allocation6] sm:$0xff] }
  0x19   :  { %v515_v11 = vld [vmem:[#allocation8 + $0x8] sm:$0xf0]  ;;  %v579_v13 = vld [vmem:[#allocation11 + $0x70] sm:$0xf]  ;;  %v168_v14 = vpack.c.b16 %v164_v2, %v164_v2  ;;  %v169_v15 = vpack.c.b16 %v165_v3, %v165_v3  ;;  %v666_v18 = vld [vmem:[#allocation11 + $0x74] sm:$0xf0]  ;;  %v110_v21 = vpack.c.bf16 %v109_v12, %v109_v12  ;;  %v514_v36 = vor.u32 %v650_v9, %v513_v8 }
  0x1a   :  { %v118_v16 = vpack.c.b16 %v116_v4, %v116_v4  ;;  %v119_v17 = vpack.c.b16 %v117_v5, %v117_v5  ;;  %v643_v19 = vld [vmem:[#allocation11 + $0xf0] sm:$0xf]  ;;  %v682_v20 = vld [vmem:[#allocation11 + $0xf4] sm:$0xf0]  ;;  %v580_v22 = vor.u32 %v666_v18, %v579_v13  ;;  %v665_v24 = vld [vmem:[#allocation11 + $0x74] sm:$0xf]  ;;  %v518_v37 = vor.u32 %v649_v10, %v515_v11 }
  0x1b   :  { %v644_v23 = vor.u32 %v682_v20, %v643_v19  ;;  %v581_v25 = vld [vmem:[#allocation11 + $0x78] sm:$0xf0]  ;;  %v681_v26 = vld [vmem:[#allocation11 + $0xf4] sm:$0xf]  ;;  %v180_v27 = vand.u32 %v178_v7, %v168_v14  ;;  %v183_v28 = vand.u32 %v178_v7, %v169_v15  ;;  %v571_v32 = vld [vmem:[#allocation11 + $0x60] sm:$0xf] }
  0x1c   :  { %v126_v29 = vsel %vm124_vm1, %v118_v16, 0  ;;  %v129_v30 = vsel %vm124_vm1, %v119_v17, 0  ;;  %v645_v31 = vld [vmem:[#allocation11 + $0xf8] sm:$0xf0]  ;;  %v664_v33 = vld [vmem:[#allocation11 + $0x64] sm:$0xf0]  ;;  %v584_v39 = vor.u32 %v665_v24, %v581_v25 }
  0x1d   :  { %138 = vmatpush.bf16.msra.mxu0 %v126_v29  ;;  %151 = vmatpush.bf16.msra.mxu1 %v129_v30  ;;  %v635_v34 = vld [vmem:[#allocation11 + $0xe0] sm:$0xf]  ;;  %v680_v35 = vld [vmem:[#allocation11 + $0xe4] sm:$0xf0]  ;;  %v107_v38 = vld [vmem:[#allocation3] sm:$0xff]  ;;  %v648_v40 = vor.u32 %v681_v26, %v645_v31  ;;  %v572_v43 = vor.u32 %v664_v33, %v571_v32  ;;  %vm172_vm3 = vcmask 138240  }
  0x1e   :  { %191 = vmatpush.bf16.msra.mxu2 %v180_v27  ;;  %204 = vmatpush.bf16.msra.mxu3 %v183_v28  ;;  %v663_v41 = vld [vmem:[#allocation11 + $0x64] sm:$0xf]  ;;  %v573_v42 = vld [vmem:[#allocation11 + $0x68] sm:$0xf0]  ;;  %v636_v44 = vor.u32 %v680_v35, %v635_v34  ;;  %v563_v47 = vld [vmem:[#allocation11 + $0x50] sm:$0xf]  ;;  %v108_v48 = vpack.c.bf16 %v107_v38, %v107_v38 }
  0x1f   :  { %v679_v45 = vld [vmem:[#allocation11 + $0xe4] sm:$0xf]  ;;  %v637_v46 = vld [vmem:[#allocation11 + $0xe8] sm:$0xf0]  ;;  %v662_v49 = vld [vmem:[#allocation11 + $0x54] sm:$0xf0]  ;;  %v576_v52 = vor.u32 %v663_v41, %v573_v42 }
  0x20   :  { %509 = vmatmul.msk.bf16.vlgmr.msra.gmra.mxu0 %vm120_vm2, %v110_v21  ;;  %510 = vmatmul.msk.bf16.vlgmr.msra.gmra.mxu1 %vm120_vm2, %v110_v21  ;;  %v627_v50 = vld [vmem:[#allocation11 + $0xd0] sm:$0xf]  ;;  %v678_v51 = vld [vmem:[#allocation11 + $0xd4] sm:$0xf0]  ;;  %v640_v53 = vor.u32 %v679_v45, %v637_v46  ;;  %v661_v54 = vld [vmem:[#allocation11 + $0x54] sm:$0xf]  ;;  %v564_v56 = vor.u32 %v662_v49, %v563_v47 }
  0x21   :  { %421 = vmatpush.bf16.msrb.mxu0 %v580_v22  ;;  %434 = vmatpush.bf16.msrb.mxu1 %v644_v23  ;;  %v565_v55 = vld [vmem:[#allocation11 + $0x58] sm:$0xf0]  ;;  %v628_v57 = vor.u32 %v678_v51, %v627_v50  ;;  %v677_v58 = vld [vmem:[#allocation11 + $0xd4] sm:$0xf]  ;;  %v555_v60 = vld [vmem:[#allocation11 + $0x40] sm:$0xf] }
  0x22   :  { %192 = vmatpush.bf16.msra.mxu2 %v514_v36  ;;  %205 = vmatpush.bf16.msra.mxu3 %v518_v37  ;;  %v629_v59 = vld [vmem:[#allocation11 + $0xd8] sm:$0xf0]  ;;  %v660_v61 = vld [vmem:[#allocation11 + $0x44] sm:$0xf0]  ;;  %v619_v62 = vld [vmem:[#allocation11 + $0xc0] sm:$0xf]  ;;  %v568_v0 = vor.u32 %v661_v54, %v565_v55 }
  0x23   :  { %v676_v63 = vld [vmem:[#allocation11 + $0xc4] sm:$0xf0]  ;;  %v632_v1 = vor.u32 %v677_v58, %v629_v59  ;;  %v659_v2 = vld [vmem:[#allocation11 + $0x44] sm:$0xf]  ;;  %v556_v3 = vor.u32 %v660_v61, %v555_v60  ;;  %v557_v5 = vld [vmem:[#allocation11 + $0x48] sm:$0xf0] }
  0x24   :  { %v620_v4 = vor.u32 %v676_v63, %v619_v62  ;;  %v675_v6 = vld [vmem:[#allocation11 + $0xc4] sm:$0xf]  ;;  %v621_v7 = vld [vmem:[#allocation11 + $0xc8] sm:$0xf0]  ;;  %v560_v8 = vor.u32 %v659_v2, %v557_v5  ;;  %v547_v10 = vld [vmem:[#allocation11 + $0x30] sm:$0xf] }
  0x25   :  { %422 = vmatpush.bf16.msrb.mxu0 %v572_v43  ;;  %435 = vmatpush.bf16.msrb.mxu1 %v636_v44  ;;  %v624_v9 = vor.u32 %v675_v6, %v621_v7  ;;  %v658_v11 = vld [vmem:[#allocation11 + $0x34] sm:$0xf0]  ;;  %v611_v12 = vld [vmem:[#allocation11 + $0xb0] sm:$0xf]  ;;  %v657_v15 = vld [vmem:[#allocation11 + $0x34] sm:$0xf] }
  0x26   :  { %447 = vmatpush.bf16.msrb.mxu2 %v584_v39  ;;  %460 = vmatpush.bf16.msrb.mxu3 %v648_v40  ;;  %v548_v13 = vor.u32 %v658_v11, %v547_v10  ;;  %v674_v14 = vld [vmem:[#allocation11 + $0xb4] sm:$0xf0]  ;;  %v549_v16 = vld [vmem:[#allocation11 + $0x38] sm:$0xf0]  ;;  %v673_v19 = vld [vmem:[#allocation11 + $0xb4] sm:$0xf] }
  0x27   :  { %519 = vmatmul.msk.bf16.vlgmr.msra.gmra.mxu2 %vm172_vm3, %v108_v48  ;;  %520 = vmatmul.msk.bf16.vlgmr.msra.gmra.mxu3 %vm172_vm3, %v108_v48  ;;  %v612_v17 = vor.u32 %v674_v14, %v611_v12  ;;  %v552_v18 = vor.u32 %v657_v15, %v549_v16  ;;  %v613_v20 = vld [vmem:[#allocation11 + $0xb8] sm:$0xf0]  ;;  %v539_v21 = vld [vmem:[#allocation11 + $0x20] sm:$0xf]  ;;  %v656_v23 = vld [vmem:[#allocation11 + $0x24] sm:$0xf0] }
  0x28   :  { %v616_v22 = vor.u32 %v673_v19, %v613_v20  ;;  %v603_v24 = vld [vmem:[#allocation11 + $0xa0] sm:$0xf]  ;;  %v672_v25 = vld [vmem:[#allocation11 + $0xa4] sm:$0xf0]  ;;  %v540_v26 = vor.u32 %v656_v23, %v539_v21  ;;  %v655_v28 = vld [vmem:[#allocation11 + $0x24] sm:$0xf] }
  0x29   :  { %423 = vmatpush.bf16.msrb.mxu0 %v564_v56  ;;  %436 = vmatpush.bf16.msrb.mxu1 %v628_v57  ;;  %v604_v27 = vor.u32 %v672_v25, %v603_v24  ;;  %v541_v29 = vld [vmem:[#allocation11 + $0x28] sm:$0xf0]  ;;  %v671_v30 = vld [vmem:[#allocation11 + $0xa4] sm:$0xf]  ;;  %v531_v34 = vld [vmem:[#allocation11 + $0x10] sm:$0xf] }
  0x2a   :  { %448 = vmatpush.bf16.msrb.mxu2 %v576_v52  ;;  %461 = vmatpush.bf16.msrb.mxu3 %v640_v53  ;;  %v544_v31 = vor.u32 %v655_v28, %v541_v29  ;;  %v605_v32 = vld [vmem:[#allocation11 + $0xa8] sm:$0xf0]  ;;  %v654_v35 = vld [vmem:[#allocation11 + $0x14] sm:$0xf0]  ;;  %v595_v36 = vld [vmem:[#allocation11 + $0x90] sm:$0xf] }
  0x2b   :  { %v608_v33 = vor.u32 %v671_v30, %v605_v32  ;;  %v532_v37 = vor.u32 %v654_v35, %v531_v34  ;;  %v670_v38 = vld [vmem:[#allocation11 + $0x94] sm:$0xf0]  ;;  %v653_v39 = vld [vmem:[#allocation11 + $0x14] sm:$0xf]  ;;  %v533_v41 = vld [vmem:[#allocation11 + $0x18] sm:$0xf0] }
  0x2c   :  { %v596_v40 = vor.u32 %v670_v38, %v595_v36  ;;  %v669_v42 = vld [vmem:[#allocation11 + $0x94] sm:$0xf]  ;;  %v536_v43 = vor.u32 %v653_v39, %v533_v41  ;;  %v597_v44 = vld [vmem:[#allocation11 + $0x98] sm:$0xf0]  ;;  %v523_v46 = vld [vmem:[#allocation11] sm:$0xf]  ;;  %v487_v36 = vstv %s945_s8 }
  0x2d   :  { %424 = vmatpush.bf16.msrb.mxu0 %v556_v3  ;;  %437 = vmatpush.bf16.msrb.mxu1 %v620_v4  ;;  %v600_v45 = vor.u32 %v669_v42, %v597_v44  ;;  %v652_v47 = vld [vmem:[#allocation11 + $0x4] sm:$0xf0]  ;;  %v587_v48 = vld [vmem:[#allocation11 + $0x80] sm:$0xf]  ;;  %v651_v51 = vld [vmem:[#allocation11 + $0x4] sm:$0xf] }
  0x2e   :  { %449 = vmatpush.bf16.msrb.mxu2 %v568_v0  ;;  %462 = vmatpush.bf16.msrb.mxu3 %v632_v1  ;;  %v524_v49 = vor.u32 %v652_v47, %v523_v46  ;;  %v668_v50 = vld [vmem:[#allocation11 + $0x84] sm:$0xf0]  ;;  %v525_v52 = vld [vmem:[#allocation11 + $0x8] sm:$0xf0]  ;;  %v667_v55 = vld [vmem:[#allocation11 + $0x84] sm:$0xf] }
  0x2f   :  { %v588_v53 = vor.u32 %v668_v50, %v587_v48  ;;  %v528_v54 = vor.u32 %v651_v51, %v525_v52  ;;  %v589_v56 = vld [vmem:[#allocation11 + $0x88] sm:$0xf0]  ;;  %v211_v60 = vld [vmem:[%s941_s4] sm:$0x3]  ;;  %s852_s16 = smov [#allocation12]   ;;  %s497_s19 = sshll.u32 %s946_s9, 4  ;;  %s498_s19 = int_to_ptr.hbm [resolvable:$true] %s497_s19 }
  0x30   :  { %v592_v57 = vor.u32 %v667_v55, %v589_v56  ;;  %v213_v63 = vperm.slane %v211_v60, 0  ;;  %v214_v0 = vperm.slane %v211_v60, 1 }
  0x31   :  { %425 = vmatpush.bf16.msrb.mxu0 %v548_v13  ;;  %438 = vmatpush.bf16.msrb.mxu1 %v612_v17  ;;  %v255_v13 = vld [vmem:[%s943_s6] sm:$0x3] }
  0x32   :  { %450 = vmatpush.bf16.msrb.mxu2 %v560_v8  ;;  %463 = vmatpush.bf16.msrb.mxu3 %v624_v9  ;;  %v257_v14 = vperm.slane %v255_v13, 0 }
  0x35   :  { %426 = vmatpush.bf16.msrb.mxu0 %v540_v26  ;;  %439 = vmatpush.bf16.msrb.mxu1 %v604_v27 }
  0x36   :  { %451 = vmatpush.bf16.msrb.mxu2 %v552_v18  ;;  %464 = vmatpush.bf16.msrb.mxu3 %v616_v22  ;;  %v258_v18 = vperm.slane %v255_v13, 1  ;;  %v475_v22 = vld [vmem:[%s944_s7] sm:$0x3]  ;;  %s495_s7 = sshll.u32 %s852_s16, 4  ;;  %s496_s7 = int_to_ptr.vmem [resolvable:$true] %s495_s7 }
  0x37   :  { %v477_v28 = vperm.slane %v475_v22, 0  ;;  %v478_v29 = vperm.slane %v475_v22, 1 }
  0x39   :  { %427 = vmatpush.bf16.msrb.mxu0 %v532_v37  ;;  %440 = vmatpush.bf16.msrb.mxu1 %v596_v40 }
  0x3a   :  { %452 = vmatpush.bf16.msrb.mxu2 %v544_v31  ;;  %465 = vmatpush.bf16.msrb.mxu3 %v608_v33 }
  0x3d   :  { %428 = vmatpush.bf16.msrb.mxu0 %v524_v49  ;;  %441 = vmatpush.bf16.msrb.mxu1 %v588_v53 }
  0x3e   :  { %453 = vmatpush.bf16.msrb.mxu2 %v536_v43  ;;  %466 = vmatpush.bf16.msrb.mxu3 %v600_v45 }
  0x42   :  { %454 = vmatpush.bf16.msrb.mxu2 %v528_v54  ;;  %467 = vmatpush.bf16.msrb.mxu3 %v592_v57 }
  0x9d   :  { %v140_v58 = vpop.f32.mrf.mxu0  ;;  %v153_v59 = vpop.f32.mrf.mxu1 }
  0xa5   :  { %v142_v61 = vpop.f32.mrf.mxu0  ;;  %v155_v62 = vpop.f32.mrf.mxu1 }
  0xaa   :  { %v194_v1 = vpop.f32.mrf.mxu2  ;;  %v207_v2 = vpop.f32.mrf.mxu3 }
  0xab   :  { %v195_v3 = vadd.f32 %v194_v1, %v140_v58  ;;  %v208_v4 = vadd.f32 %v207_v2, %v153_v59 }
  0xad   :  { %v217_v5 = vadd.f32 %v213_v63, %v195_v3  ;;  %v218_v6 = vadd.f32 %v214_v0, %v208_v4 }
  0xaf   :  { %v219_v7 = vmax.f32 %v217_v5, 0.0  ;;  %v220_v8 = vmax.f32 %v218_v6, 0.0 }
  0xb1   :  { %v221_v9 = vpack.c.bf16 %v219_v7, %v219_v7  ;;  %v222_v10 = vpack.c.bf16 %v220_v8, %v220_v8 }
  0xb2   :  { %v196_v11 = vpop.f32.mrf.mxu2  ;;  %v209_v12 = vpop.f32.mrf.mxu3 }
  0xb3   :  { %429 = vmatmul.bf16.vlgmr.msrb.gmra.mxu0 %v221_v9  ;;  %442 = vmatmul.bf16.vlgmr.msrb.gmra.mxu1 %v222_v10 }
  0xb4   :  { %455 = vmatmul.bf16.vlgmr.msrb.gmra.mxu2 %v221_v9  ;;  %468 = vmatmul.bf16.vlgmr.msrb.gmra.mxu3 %v222_v10 }
 0x130   :  { %v430_v15 = vpop.f32.mrf.mxu0  ;;  %v443_v16 = vpop.f32.mrf.mxu1 }
 0x131   :  { %v431_v17 = vadd.f32 %v430_v15, %v257_v14 }
 0x133   :  { %v444_v19 = vadd.f32 %v443_v16, %v431_v17 }
 0x135   :  { %v473_v26 = vmax.f32 %v444_v19, 0.0 }
 0x137   :  { %v456_v20 = vpop.f32.mrf.mxu2  ;;  %v469_v21 = vpop.f32.mrf.mxu3  ;;  %v481_v31 = vmul.f32 %v477_v28, %v473_v26 }
 0x138   :  { %v457_v23 = vadd.f32 %v456_v20, %v258_v18  ;;  %v432_v24 = vpop.f32.mrf.mxu0  ;;  %v445_v25 = vpop.f32.mrf.mxu1 }
 0x13a   :  { %v470_v27 = vadd.f32 %v469_v21, %v457_v23 }
 0x13c   :  { %v474_v30 = vmax.f32 %v470_v27, 0.0 }
 0x13e   :  { %v482_v32 = vmul.f32 %v478_v29, %v474_v30 }
 0x13f   :  { %v458_v33 = vpop.f32.mrf.mxu2  ;;  %v471_v34 = vpop.f32.mrf.mxu3 }
 0x140   :  { %v483_v35 = vadd.f32 %v482_v32, %v481_v31 }
 0x142   :  { %484 = vadd.xlane.f32.xlu0 %v483_v35 }
 0x1b5   :  { %v485_v37 = vpop.xlane.xlu0 %484 }
 0x1b6   :  { %v488_v38 = vadd.f32 %v487_v36, %v485_v37 }
 0x1b8   :  { %489 = vst [vmem:[#allocation12] sm:$0xff] %v488_v38 }
 0x1b9   :  { %500 = dma.vmem_to_hbm [thread:$0]  %s496_s7, 128, %s498_s19, [#allocation5]  }
 0x1ba   :  { %842 = dma.done.wait [#allocation5], 128  }
 0x1bb   :  { %843 = vsyncadd [#allocation5], 4294967168 }
 0x1bc   :  { %505 = vsyncpa [#allocation4], 1 }
 0x1bd   :  { %506 = vsyncpa [#allocation7], 1 }
 0x1be   :  { %507 = vsyncpa [#allocation10], 1 }
 0x1bf   :  { %508 = vsyncpa [#allocation5], 1 }

</bundles_post_ra>
